<compile_context>
chip_gen: v7x
topology: tpu7x:2x2x1
jax: 0.10.0
libtpu: 0.0.40
codegen_flags: <defaults>
</compile_context>

<pallas_src>
from functools import partial

import jax
import jax.numpy as jnp
import numpy as np
from jax.experimental import pallas as pl
from jax.experimental.pallas import tpu as pltpu

# ---- small shapes consistent with the module (dim/K scaled down) ----
BATCH = 2
SEQ = 8
DIM = 128                      # "dim" feature dimension (default 1024, scaled down)
VOCAB = 32
QUEUE_K = int(BATCH * 2.5)     # K = 2.5 * batchsize  -> 5
MOMENTUM = 0.999
TEMP = 0.05                    # unused in forward (kept for fidelity)

# packed key/query parameter slab layout (all params are [*, DIM] rows)
OFF_EMB = 0
OFF_W = OFF_EMB + VOCAB
OFF_B = OFF_W + DIM
TOTAL_ROWS = OFF_B + 1

# Momentum-update row tile. bf16 storage halves the HBM traffic (kernel 1 is purely
# bandwidth-bound: q+k read, k written). At production DIM=1024 keep the double-buffered
# working set under the scoped-VMEM default:
#   v5e (16 MiB default):  ROW_TILE <= 512
#   v6e (32 MiB default):  ROW_TILE = 512..1024
#   v7x (32 MiB default / 64 MiB phys, ~3.2 TB/s HBM): ROW_TILE = 1024 (easy in bf16) and/or
#       pipeline_mode=pl.Buffered(3) so the pass stays roofline- rather than overhead-bound.
ROW_TILE = 64                  # toy size (multiple of 16 -> native bf16 sublane tiling)


def pack_params(params):
    """Pack {emb, w, b} (all [*, DIM]) into one padded bf16 (rows, DIM) slab."""
    slab = jnp.concatenate([params["emb"], params["w"], params["b"]], axis=0)
    slab = slab.astype(jnp.bfloat16)       # bf16 storage; blends stay f32 inside kernels
    rows = slab.shape[0]
    rpad = ((rows + ROW_TILE - 1) // ROW_TILE) * ROW_TILE
    if rpad != rows:
        slab = jnp.concatenate(
            [slab, jnp.zeros((rpad - rows, slab.shape[1]), slab.dtype)], axis=0)
    return slab


# ------------------------------------------------------------------
# Kernel 1: fused momentum update of ALL key-encoder params
#   k = k*M + q*(1-M): bf16 loads -> f32 blend (v5e-safe, no bf16 VALU) -> bf16 store,
#   one tiled streaming pass over the packed slab, written in place via
#   input_output_aliases (no second HBM copy).
# ------------------------------------------------------------------
def _momentum_kernel(q_ref, k_ref, out_ref, *, momentum):
    q = q_ref[...].astype(jnp.float32)
    k = k_ref[...].astype(jnp.float32)
    out_ref[...] = (k * momentum + q * (1.0 - momentum)).astype(out_ref.dtype)


def momentum_update(q_slab, k_slab, momentum=MOMENTUM):
    rows, d = q_slab.shape
    assert rows % ROW_TILE == 0
    return pl.pallas_call(
        partial(_momentum_kernel, momentum=momentum),
        out_shape=jax.ShapeDtypeStruct((rows, d), k_slab.dtype),
        grid=(rows // ROW_TILE,),
        in_specs=[pl.BlockSpec((ROW_TILE, d), lambda i: (i, 0)),
                  pl.BlockSpec((ROW_TILE, d), lambda i: (i, 0))],
        out_specs=pl.BlockSpec((ROW_TILE, d), lambda i: (i, 0)),
        input_output_aliases={1: 0},        # update key params in place
        compiler_params=pltpu.CompilerParams(dimension_semantics=("parallel",)),
    )(q_slab, k_slab)


# ------------------------------------------------------------------
# Kernel 2: key-encoder dense layer + _tokens_mean_pooling (mode='mean')
#           + fused _dequeue_and_enqueue
#   h      = tanh( tok @ W_blend + b_blend )   (bf16 MXU operands, f32 accumulate;
#                                               tok/W/b are pre-blended in the wrapper from
#                                               (q, old-k) so nothing serializes on kernel 1
#                                               and only ONE activation/weight stream is DMA'd)
#   pooled = P @ h   where P is the block-diagonal, 1/denom-normalized mask  (MXU pooling)
#   enqueue: this tile's pooled rows are DMA'd from the VMEM output block into the
#   HBM-resident (pl.ANY), input-output-aliased queue; only those rows are written.
# Grid is over row-tiles of the flattened (B*S, D) token stream; each tile covers whole
# batches so the pooling matmul stays tile-local.
# ------------------------------------------------------------------
def _encode_pool_enqueue_kernel(tok_ref, w_ref, b_ref, pool_ref, ptr_ref, queue_in,
                                out_ref, queue_out, ptr_out, sem, *, K, R):
    # dense + tanh on the MXU (weight & bias already momentum-blended -> no per-tile VPU blend)
    h = jnp.tanh(jnp.dot(tok_ref[...], w_ref[...],
                         preferred_element_type=jnp.float32) + b_ref[...])   # (TM, D) f32
    # masked-mean pooling on the MXU; 1/clamp(sum(mask),1e-9) is folded into pool_ref
    out_ref[0] = jnp.dot(pool_ref[0], h, preferred_element_type=jnp.float32)  # (R, D)

    # ---- fused _dequeue_and_enqueue (only the R rows of this tile are written) ----
    del queue_in                       # aliased to queue_out; untouched rows keep old values
    t = pl.program_id(0)
    total_b = pl.num_programs(0) * R   # total keys enqueued by this forward
    p = ptr_ref[0]
    start = (p + t * R) % K            # queue row for this tile's first pooled key

    @pl.when(start + R <= K)
    def _no_wrap():
        cp = pltpu.make_async_copy(out_ref.at[0], queue_out.at[pl.ds(start, R)], sem.at[0])
        cp.start()
        cp.wait()

    @pl.when(start + R > K)
    def _wrap():
        # rare wrap (K % R != 0): DMA slices cannot take a dynamic length, so instead of two
        # variable-length contiguous copies we start all R single-row copies back-to-back
        # (overlapped, one semaphore slot each) and only then wait on them.
        for i in range(R):
            row = (start + i) % K
            pltpu.make_async_copy(out_ref.at[0, pl.ds(i, 1)],
                                  queue_out.at[pl.ds(row, 1)], sem.at[i]).start()
        for i in range(R):
            row = (start + i) % K
            pltpu.make_async_copy(out_ref.at[0, pl.ds(i, 1)],
                                  queue_out.at[pl.ds(row, 1)], sem.at[i]).wait()

    # new ptr = (ptr + B) % K matches BOTH branches of the PyTorch _dequeue_and_enqueue
    ptr_out[0] = (p + total_b) % K


def encode_pool_enqueue(tok, w, b, attention_mask, queue, queue_ptr):
    BS, D = tok.shape
    B, S = attention_mask.shape
    K = queue.shape[0]
    # Tile covers whole batches. At real scale choose rows_per_tile so R = rows_per_tile//S >= 8
    # (pooled output block fills >= 8 sublanes -> unmasked stores / good MXU utilization) and an
    # even number of tiles (balanced megacore sharding on v7x).
    rows_per_tile = min(BS, (max(512, 8 * S) // S) * S)
    assert rows_per_tile % S == 0 and BS % rows_per_tile == 0
    R = rows_per_tile // S                 # batches (pooled rows) per tile
    ntiles = BS // rows_per_tile

    # Normalized, block-diagonal pooling matrix built once in the wrapper:
    #   pool[t, r, r*S + s] = mask[t*R + r, s] / clamp(sum_s mask[t*R + r], 1e-9)
    mask_f = attention_mask.astype(jnp.float32)
    mn = mask_f / jnp.maximum(jnp.sum(mask_f, axis=1, keepdims=True), 1e-9)   # (B, S)
    mn = mn.reshape(ntiles, R, S)
    pool = (jnp.eye(R, dtype=jnp.float32)[None, :, :, None] * mn[:, None, :, :])
    pool = pool.reshape(ntiles, R, rows_per_tile)

    pooled, new_queue, new_ptr = pl.pallas_call(
        partial(_encode_pool_enqueue_kernel, K=K, R=R),
        out_shape=(jax.ShapeDtypeStruct((ntiles, R, D), jnp.float32),
                   jax.ShapeDtypeStruct((K, D), queue.dtype),
                   jax.ShapeDtypeStruct((1,), jnp.int32)),
        grid=(ntiles,),
        in_specs=[
            pl.BlockSpec((rows_per_tile, D), lambda t: (t, 0)),        # gathered tokens (bf16)
            pl.BlockSpec((D, D), lambda t: (0, 0)),                    # blended W (bf16)
            pl.BlockSpec((1, D), lambda t: (0, 0)),                    # blended bias (f32)
            pl.BlockSpec((1, R, rows_per_tile), lambda t: (t, 0, 0)),  # pooling matrix (f32)
            pl.BlockSpec(memory_space=pltpu.MemorySpace.SMEM),         # queue_ptr
            pl.BlockSpec(memory_space=pl.ANY),                         # queue (stays in HBM)
        ],
        out_specs=(
            pl.BlockSpec((1, R, D), lambda t: (t, 0, 0)),              # pooled sentence keys
            pl.BlockSpec(memory_space=pl.ANY),                         # queue (aliased, HBM)
            pl.BlockSpec(memory_space=pltpu.MemorySpace.SMEM),         # new queue_ptr
        ),
        scratch_shapes=[pltpu.SemaphoreType.DMA((R,))],
        input_output_aliases={5: 1},        # queue updated in place (only B rows DMA'd)
        compiler_params=pltpu.CompilerParams(
            # "arbitrary": the per-tile queue writeback + resident SMEM ptr output make this
            # axis order-sensitive; at toy size there is a single tile anyway.
            dimension_semantics=("arbitrary",),
            has_side_effects=True),
    )(tok, w, b, pool, queue_ptr, queue)
    return pooled.reshape(B, D), new_queue, new_ptr


# ------------------------------------------------------------------
# Full forward (no_grad path of SimCseMoCoClassifier.forward)
# ------------------------------------------------------------------
def simcse_moco_forward(q_slab, k_slab, queue, queue_ptr, input_ids, attention_mask):
    # 1. momentum update of every key-encoder parameter (single fused, tiled,
    #    in-place-aliased, bf16-storage streaming kernel over the packed slab)
    new_k_slab = momentum_update(q_slab, k_slab)

    # 2. key-encoder forward producing pooled sentence embeddings
    # TODO(synk): full RobertaModel encoder_k is not reproduced; stand-in is embedding
    # lookup (plain-JAX gather glue) + one dense+tanh layer. The tiny parameter blends the
    # stand-in touches are recomputed here from (q, old-k) — identical to the updated key
    # params — so the encode never serializes behind the full-table pass above and the
    # kernel streams ONE gathered token stream and ONE bf16 weight (half the DMA traffic).
    m = MOMENTUM

    def blend(lo, hi):
        return (k_slab[lo:hi].astype(jnp.float32) * m
                + q_slab[lo:hi].astype(jnp.float32) * (1.0 - m))

    emb_k = blend(OFF_EMB, OFF_EMB + VOCAB)                   # (VOCAB, D) f32, tiny
    w_k = blend(OFF_W, OFF_W + DIM).astype(jnp.bfloat16)      # (D, D)  MXU operand
    b_k = blend(OFF_B, OFF_B + 1)                             # (1, D)  f32 (added post-MXU)
    ids = input_ids.reshape(-1)
    tok = jnp.take(emb_k, ids, axis=0).astype(jnp.bfloat16)   # (B*S, D) single token stream

    # 3. encode + masked mean pooling + dequeue/enqueue (fused into one pallas_call)
    sentence_emb, new_queue, new_ptr = encode_pool_enqueue(
        tok, w_k, b_k, attention_mask, queue, queue_ptr)

    # PyTorch forward returns None; return the mutated state instead.
    return new_k_slab, new_queue, new_ptr, sentence_emb


if __name__ == "__main__":
    key = jax.random.PRNGKey(0)
    k_emb, k_w, k_b, k_ids, k_queue = jax.random.split(key, 5)

    params_q = {
        "emb": 0.02 * jax.random.normal(k_emb, (VOCAB, DIM), jnp.float32),
        "w":   0.02 * jax.random.normal(k_w, (DIM, DIM), jnp.float32),
        "b":   0.02 * jax.random.normal(k_b, (1, DIM), jnp.float32),
    }
    # __init__ copies encoder_q params into encoder_k
    params_k = {name: v for name, v in params_q.items()}

    q_slab = pack_params(params_q)          # packed once at init; kernels keep it packed
    k_slab = pack_params(params_k)

    # queue buffer: randn(K, dim) normalized along dim=0 (exactly as in __init__)
    queue = jax.random.normal(k_queue, (QUEUE_K, DIM), jnp.float32)
    queue = queue / jnp.maximum(jnp.linalg.norm(queue, axis=0, keepdims=True), 1e-12)
    queue_ptr = jnp.zeros((1,), jnp.int32)

    input_ids = jax.random.randint(k_ids, (BATCH, SEQ), 0, VOCAB, dtype=jnp.int32)
    lengths = jnp.array([SEQ, SEQ - 3], jnp.int32)
    attention_mask = (jnp.arange(SEQ)[None, :] < lengths[:, None]).astype(jnp.float32)

    queue_np = np.asarray(queue)            # host snapshot for the post-run checks

    fwd = jax.jit(simcse_moco_forward)
    new_k_slab, new_queue, new_ptr, sent = fwd(
        q_slab, k_slab, queue, queue_ptr, input_ids, attention_mask)
    jax.block_until_ready((new_k_slab, new_queue, new_ptr, sent))

    # ---- lightweight pure-JAX reference check (f32 math; bf16 MXU tolerance) ----
    m = MOMENTUM
    emb_f = (k_slab[OFF_EMB:OFF_EMB + VOCAB].astype(jnp.float32) * m
             + q_slab[OFF_EMB:OFF_EMB + VOCAB].astype(jnp.float32) * (1 - m))
    w_f = (k_slab[OFF_W:OFF_W + DIM].astype(jnp.float32) * m
           + q_slab[OFF_W:OFF_W + DIM].astype(jnp.float32) * (1 - m))
    b_f = (k_slab[OFF_B:OFF_B + 1].astype(jnp.float32) * m
           + q_slab[OFF_B:OFF_B + 1].astype(jnp.float32) * (1 - m))
    tok_f = jnp.take(emb_f, input_ids.reshape(-1), axis=0)
    h_f = jnp.tanh(tok_f @ w_f + b_f).reshape(BATCH, SEQ, DIM)
    msk = attention_mask[..., None]
    sent_ref = (h_f * msk).sum(1) / jnp.maximum(msk.sum(1), 1e-9)
    np.testing.assert_allclose(np.asarray(sent), np.asarray(sent_ref), atol=2e-2, rtol=2e-2)

    # enqueue semantics: ptr was 0, so rows [0, BATCH) hold the new keys, rest untouched
    sent_np = np.asarray(sent)
    new_queue_np = np.asarray(new_queue)
    np.testing.assert_allclose(new_queue_np[:BATCH], sent_np, atol=1e-6)
    np.testing.assert_allclose(new_queue_np[BATCH:], queue_np[BATCH:], atol=1e-6)
    assert int(np.asarray(new_ptr)[0]) == (0 + BATCH) % QUEUE_K

    print("KERNEL_OK")
</pallas_src>

<mosaic_0001>
module attributes {stable_mosaic.version = 11 : i64} {
  func.func @_encode_pool_enqueue_kernel(%arg0: i32, %arg1: memref<16x128xbf16, #tpu.memory_space<vmem>>, %arg2: memref<128x128xbf16, #tpu.memory_space<vmem>>, %arg3: memref<1x128xf32, #tpu.memory_space<vmem>>, %arg4: memref<1x2x16xf32, #tpu.memory_space<vmem>>, %arg5: memref<1xi32, #tpu.memory_space<smem>>, %arg6: memref<5x128xf32, #tpu.memory_space<any>>, %arg7: memref<1x2x128xf32, #tpu.memory_space<vmem>>, %arg8: memref<5x128xf32, #tpu.memory_space<any>>, %arg9: memref<1xi32, #tpu.memory_space<smem>>, %arg10: memref<2x!tpu.dma_semaphore, #tpu.memory_space<semaphore_mem>>) attributes {dimension_semantics = [#tpu.dimension_semantics<arbitrary>], iteration_bounds = array<i64: 1>, scalar_prefetch = 0 : i64, scratch_operands = 1 : i64, tpu.core_type = #tpu.core_type<tc>, window_params = [{transform_indices = @transform_0, window_bounds = array<i64: 16, 128>}, {pipeline_mode = #tpu.pipeline_mode<synchronous>, transform_indices = @transform_1, window_bounds = array<i64: 128, 128>}, {pipeline_mode = #tpu.pipeline_mode<synchronous>, transform_indices = @transform_2, window_bounds = array<i64: 1, 128>}, {transform_indices = @transform_3, window_bounds = array<i64: 1, 2, 16>}, {transform_indices = @transform_4, window_bounds = array<i64: 1>}, {}, {transform_indices = @transform_6, window_bounds = array<i64: 1, 2, 128>}, {}, {transform_indices = @transform_8, window_bounds = array<i64: 1>}]} {
    %c0 = arith.constant 0 : index
    %c0_0 = arith.constant 0 : index
    %0 = vector.load %arg1[%c0, %c0_0] : memref<16x128xbf16, #tpu.memory_space<vmem>>, vector<16x128xbf16>
    %c0_1 = arith.constant 0 : index
    %c0_2 = arith.constant 0 : index
    %1 = vector.load %arg2[%c0_1, %c0_2] : memref<128x128xbf16, #tpu.memory_space<vmem>>, vector<128x128xbf16>
    %cst = arith.constant dense<0.000000e+00> : vector<16x128xf32>
    %2 = tpu.matmul %0, %1, %cst {dimension_numbers = #tpu.dot_dimension_numbers<[1], [0], [0], [1], [0, 0, 1, 1], [], []>} : vector<16x128xbf16>, vector<128x128xbf16>, vector<16x128xf32> -> vector<16x128xf32>
    %c0_3 = arith.constant 0 : index
    %c0_4 = arith.constant 0 : index
    %3 = vector.load %arg3[%c0_3, %c0_4] : memref<1x128xf32, #tpu.memory_space<vmem>>, vector<1x128xf32>
    %4 = vector.broadcast %3 : vector<1x128xf32> to vector<16x128xf32>
    %5 = arith.addf %2, %4 : vector<16x128xf32>
    %6 = math.tanh %5 : vector<16x128xf32>
    %c0_5 = arith.constant 0 : index
    %c0_6 = arith.constant 0 : index
    %c0_7 = arith.constant 0 : index
    %7 = vector.load %arg4[%c0_5, %c0_6, %c0_7] : memref<1x2x16xf32, #tpu.memory_space<vmem>>, vector<1x2x16xf32>
    %8 = vector.shape_cast %7 : vector<1x2x16xf32> to vector<2x16xf32>
    %cst_8 = arith.constant dense<0.000000e+00> : vector<2x128xf32>
    %9 = tpu.matmul %8, %6, %cst_8 {dimension_numbers = #tpu.dot_dimension_numbers<[1], [0], [0], [1], [0, 0, 1, 1], [], []>} : vector<2x16xf32>, vector<16x128xf32>, vector<2x128xf32> -> vector<2x128xf32>
    %c0_9 = arith.constant 0 : index
    %c0_10 = arith.constant 0 : index
    %c0_11 = arith.constant 0 : index
    %10 = vector.load %arg7[%c0_9, %c0_10, %c0_11] : memref<1x2x128xf32, #tpu.memory_space<vmem>>, vector<1x2x128xf32>
    %11 = vector.shape_cast %10 : vector<1x2x128xf32> to vector<2x128xf32>
    %12 = vector.shape_cast %9 : vector<2x128xf32> to vector<1x2x128xf32>
    tpu.vector_store %arg7[%c0_9, %c0_10, %c0_11], %12 {strides = array<i32>} : memref<1x2x128xf32, #tpu.memory_space<vmem>>, vector<1x2x128xf32>,
    %c0_12 = arith.constant 0 : index
    %13 = memref.load %arg5[%c0_12] : memref<1xi32, #tpu.memory_space<smem>>
    %c2_i32 = arith.constant 2 : i32
    %14 = arith.muli %arg0, %c2_i32 : i32
    %15 = arith.addi %13, %14 : i32
    %c5_i32 = arith.constant 5 : i32
    %c0_i32 = arith.constant 0 : i32
    %16 = arith.cmpi eq, %c5_i32, %c0_i32 : i32
    %c1_i32 = arith.constant 1 : i32
    %17 = arith.select %16, %c1_i32, %c5_i32 : i32
    %18 = arith.remsi %15, %17 : i32
    %c0_i32_13 = arith.constant 0 : i32
    %19 = arith.cmpi ne, %18, %c0_i32_13 : i32
    %c0_i32_14 = arith.constant 0 : i32
    %20 = arith.cmpi slt, %18, %c0_i32_14 : i32
    %c0_i32_15 = arith.constant 0 : i32
    %21 = arith.cmpi slt, %17, %c0_i32_15 : i32
    %22 = arith.xori %20, %21 : i1
    %23 = arith.andi %22, %19 : i1
    %24 = arith.addi %18, %17 : i32
    %25 = arith.select %23, %24, %18 : i32
    %c2_i32_16 = arith.constant 2 : i32
    %26 = arith.addi %25, %c2_i32_16 : i32
    %c5_i32_17 = arith.constant 5 : i32
    %27 = arith.cmpi sle, %26, %c5_i32_17 : i32
    %28 = arith.extui %27 : i1 to i32
    %c0_i32_18 = arith.constant 0 : i32
    %29 = arith.cmpi ne, %28, %c0_i32_18 : i32
    scf.if %29 {
      %c0_i32_30 = arith.constant 0 : i32
      %c0_i32_31 = arith.constant 0 : i32
      %c0_i32_32 = arith.constant 0 : i32
      %c0_i32_33 = arith.constant 0 : i32
      %46 = tpu.memref_slice %arg7[%c0_i32_30, %c0_i32_32, %c0_i32_33] : memref<1x2x128xf32, #tpu.memory_space<vmem>> -> memref<1x2x128xf32, #tpu.memory_space<vmem>>
      %47 = tpu.memref_squeeze %46 : memref<1x2x128xf32, #tpu.memory_space<vmem>> -> memref<2x128xf32, #tpu.memory_space<vmem>>
      %c0_i32_34 = arith.constant 0 : i32
      %48 = tpu.memref_slice %arg8[%25, %c0_i32_34] : memref<5x128xf32, #tpu.memory_space<any>> -> memref<2x128xf32, #tpu.memory_space<any>>
      %49 = tpu.memref_slice %arg10[%c0_i32_31] : memref<2x!tpu.dma_semaphore, #tpu.memory_space<semaphore_mem>> -> memref<1x!tpu.dma_semaphore, #tpu.memory_space<semaphore_mem>>
      %50 = tpu.memref_squeeze %49 : memref<1x!tpu.dma_semaphore, #tpu.memory_space<semaphore_mem>> -> memref<!tpu.dma_semaphore, #tpu.memory_space<semaphore_mem>>
      tpu.enqueue_dma source(%47 : memref<2x128xf32, #tpu.memory_space<vmem>>) target(%48 : memref<2x128xf32, #tpu.memory_space<any>>) target_semaphore(%50 : memref<!tpu.dma_semaphore, #tpu.memory_space<semaphore_mem>>)
      %c0_i32_35 = arith.constant 0 : i32
      %c0_i32_36 = arith.constant 0 : i32
      %c0_i32_37 = arith.constant 0 : i32
      %c0_i32_38 = arith.constant 0 : i32
      %51 = tpu.memref_slice %arg7[%c0_i32_35, %c0_i32_37, %c0_i32_38] : memref<1x2x128xf32, #tpu.memory_space<vmem>> -> memref<1x2x128xf32, #tpu.memory_space<vmem>>
      %52 = tpu.memref_squeeze %51 : memref<1x2x128xf32, #tpu.memory_space<vmem>> -> memref<2x128xf32, #tpu.memory_space<vmem>>
      %c0_i32_39 = arith.constant 0 : i32
      %53 = tpu.memref_slice %arg8[%25, %c0_i32_39] : memref<5x128xf32, #tpu.memory_space<any>> -> memref<2x128xf32, #tpu.memory_space<any>>
      %54 = tpu.memref_slice %arg10[%c0_i32_36] : memref<2x!tpu.dma_semaphore, #tpu.memory_space<semaphore_mem>> -> memref<1x!tpu.dma_semaphore, #tpu.memory_space<semaphore_mem>>
      %55 = tpu.memref_squeeze %54 : memref<1x!tpu.dma_semaphore, #tpu.memory_space<semaphore_mem>> -> memref<!tpu.dma_semaphore, #tpu.memory_space<semaphore_mem>>
      tpu.wait_dma2 semaphore(%55 : memref<!tpu.dma_semaphore, #tpu.memory_space<semaphore_mem>>) src(%52 : memref<2x128xf32, #tpu.memory_space<vmem>>) dst(%53 : memref<2x128xf32, #tpu.memory_space<any>>)
    } else {
    }
    %c2_i32_19 = arith.constant 2 : i32
    %30 = arith.addi %25, %c2_i32_19 : i32
    %c5_i32_20 = arith.constant 5 : i32
    %31 = arith.cmpi sgt, %30, %c5_i32_20 : i32
    %32 = arith.extui %31 : i1 to i32
    %c0_i32_21 = arith.constant 0 : i32
    %33 = arith.cmpi ne, %32, %c0_i32_21 : i32
    scf.if %33 {
      %c0_i32_30 = arith.constant 0 : i32
      %46 = arith.addi %25, %c0_i32_30 : i32
      %c5_i32_31 = arith.constant 5 : i32
      %c0_i32_32 = arith.constant 0 : i32
      %47 = arith.cmpi eq, %c5_i32_31, %c0_i32_32 : i32
      %c1_i32_33 = arith.constant 1 : i32
      %48 = arith.select %47, %c1_i32_33, %c5_i32_31 : i32
      %49 = arith.remsi %46, %48 : i32
      %c0_i32_34 = arith.constant 0 : i32
      %50 = arith.cmpi ne, %49, %c0_i32_34 : i32
      %c0_i32_35 = arith.constant 0 : i32
      %51 = arith.cmpi slt, %49, %c0_i32_35 : i32
      %c0_i32_36 = arith.constant 0 : i32
      %52 = arith.cmpi slt, %48, %c0_i32_36 : i32
      %53 = arith.xori %51, %52 : i1
      %54 = arith.andi %53, %50 : i1
      %55 = arith.addi %49, %48 : i32
      %56 = arith.select %54, %55, %49 : i32
      %c0_i32_37 = arith.constant 0 : i32
      %c0_i32_38 = arith.constant 0 : i32
      %c0_i32_39 = arith.constant 0 : i32
      %c0_i32_40 = arith.constant 0 : i32
      %57 = tpu.memref_slice %arg7[%c0_i32_37, %c0_i32_39, %c0_i32_40] : memref<1x2x128xf32, #tpu.memory_space<vmem>> -> memref<1x1x128xf32, #tpu.memory_space<vmem>>
      %58 = tpu.memref_squeeze %57 : memref<1x1x128xf32, #tpu.memory_space<vmem>> -> memref<1x128xf32, #tpu.memory_space<vmem>>
      %c0_i32_41 = arith.constant 0 : i32
      %59 = tpu.memref_slice %arg8[%56, %c0_i32_41] : memref<5x128xf32, #tpu.memory_space<any>> -> memref<1x128xf32, #tpu.memory_space<any>>
      %60 = tpu.memref_slice %arg10[%c0_i32_38] : memref<2x!tpu.dma_semaphore, #tpu.memory_space<semaphore_mem>> -> memref<1x!tpu.dma_semaphore, #tpu.memory_space<semaphore_mem>>
      %61 = tpu.memref_squeeze %60 : memref<1x!tpu.dma_semaphore, #tpu.memory_space<semaphore_mem>> -> memref<!tpu.dma_semaphore, #tpu.memory_space<semaphore_mem>>
      tpu.enqueue_dma source(%58 : memref<1x128xf32, #tpu.memory_space<vmem>>) target(%59 : memref<1x128xf32, #tpu.memory_space<any>>) target_semaphore(%61 : memref<!tpu.dma_semaphore, #tpu.memory_space<semaphore_mem>>)
      %c1_i32_42 = arith.constant 1 : i32
      %62 = arith.addi %25, %c1_i32_42 : i32
      %c5_i32_43 = arith.constant 5 : i32
      %c0_i32_44 = arith.constant 0 : i32
      %63 = arith.cmpi eq, %c5_i32_43, %c0_i32_44 : i32
      %c1_i32_45 = arith.constant 1 : i32
      %64 = arith.select %63, %c1_i32_45, %c5_i32_43 : i32
      %65 = arith.remsi %62, %64 : i32
      %c0_i32_46 = arith.constant 0 : i32
      %66 = arith.cmpi ne, %65, %c0_i32_46 : i32
      %c0_i32_47 = arith.constant 0 : i32
      %67 = arith.cmpi slt, %65, %c0_i32_47 : i32
      %c0_i32_48 = arith.constant 0 : i32
      %68 = arith.cmpi slt, %64, %c0_i32_48 : i32
      %69 = arith.xori %67, %68 : i1
      %70 = arith.andi %69, %66 : i1
      %71 = arith.addi %65, %64 : i32
      %72 = arith.select %70, %71, %65 : i32
      %c0_i32_49 = arith.constant 0 : i32
      %c1_i32_50 = arith.constant 1 : i32
      %c1_i32_51 = arith.constant 1 : i32
      %c0_i32_52 = arith.constant 0 : i32
      %73 = tpu.memref_slice %arg7[%c0_i32_49, %c1_i32_51, %c0_i32_52] : memref<1x2x128xf32, #tpu.memory_space<vmem>> -> memref<1x1x128xf32, #tpu.memory_space<vmem>>
      %74 = tpu.memref_squeeze %73 : memref<1x1x128xf32, #tpu.memory_space<vmem>> -> memref<1x128xf32, #tpu.memory_space<vmem>>
      %c0_i32_53 = arith.constant 0 : i32
      %75 = tpu.memref_slice %arg8[%72, %c0_i32_53] : memref<5x128xf32, #tpu.memory_space<any>> -> memref<1x128xf32, #tpu.memory_space<any>>
      %76 = tpu.memref_slice %arg10[%c1_i32_50] : memref<2x!tpu.dma_semaphore, #tpu.memory_space<semaphore_mem>> -> memref<1x!tpu.dma_semaphore, #tpu.memory_space<semaphore_mem>>
      %77 = tpu.memref_squeeze %76 : memref<1x!tpu.dma_semaphore, #tpu.memory_space<semaphore_mem>> -> memref<!tpu.dma_semaphore, #tpu.memory_space<semaphore_mem>>
      tpu.enqueue_dma source(%74 : memref<1x128xf32, #tpu.memory_space<vmem>>) target(%75 : memref<1x128xf32, #tpu.memory_space<any>>) target_semaphore(%77 : memref<!tpu.dma_semaphore, #tpu.memory_space<semaphore_mem>>)
      %c0_i32_54 = arith.constant 0 : i32
      %78 = arith.addi %25, %c0_i32_54 : i32
      %c5_i32_55 = arith.constant 5 : i32
      %c0_i32_56 = arith.constant 0 : i32
      %79 = arith.cmpi eq, %c5_i32_55, %c0_i32_56 : i32
      %c1_i32_57 = arith.constant 1 : i32
      %80 = arith.select %79, %c1_i32_57, %c5_i32_55 : i32
      %81 = arith.remsi %78, %80 : i32
      %c0_i32_58 = arith.constant 0 : i32
      %82 = arith.cmpi ne, %81, %c0_i32_58 : i32
      %c0_i32_59 = arith.constant 0 : i32
      %83 = arith.cmpi slt, %81, %c0_i32_59 : i32
      %c0_i32_60 = arith.constant 0 : i32
      %84 = arith.cmpi slt, %80, %c0_i32_60 : i32
      %85 = arith.xori %83, %84 : i1
      %86 = arith.andi %85, %82 : i1
      %87 = arith.addi %81, %80 : i32
      %88 = arith.select %86, %87, %81 : i32
      %c0_i32_61 = arith.constant 0 : i32
      %c0_i32_62 = arith.constant 0 : i32
      %c0_i32_63 = arith.constant 0 : i32
      %c0_i32_64 = arith.constant 0 : i32
      %89 = tpu.memref_slice %arg7[%c0_i32_61, %c0_i32_63, %c0_i32_64] : memref<1x2x128xf32, #tpu.memory_space<vmem>> -> memref<1x1x128xf32, #tpu.memory_space<vmem>>
      %90 = tpu.memref_squeeze %89 : memref<1x1x128xf32, #tpu.memory_space<vmem>> -> memref<1x128xf32, #tpu.memory_space<vmem>>
      %c0_i32_65 = arith.constant 0 : i32
      %91 = tpu.memref_slice %arg8[%88, %c0_i32_65] : memref<5x128xf32, #tpu.memory_space<any>> -> memref<1x128xf32, #tpu.memory_space<any>>
      %92 = tpu.memref_slice %arg10[%c0_i32_62] : memref<2x!tpu.dma_semaphore, #tpu.memory_space<semaphore_mem>> -> memref<1x!tpu.dma_semaphore, #tpu.memory_space<semaphore_mem>>
      %93 = tpu.memref_squeeze %92 : memref<1x!tpu.dma_semaphore, #tpu.memory_space<semaphore_mem>> -> memref<!tpu.dma_semaphore, #tpu.memory_space<semaphore_mem>>
      tpu.wait_dma2 semaphore(%93 : memref<!tpu.dma_semaphore, #tpu.memory_space<semaphore_mem>>) src(%90 : memref<1x128xf32, #tpu.memory_space<vmem>>) dst(%91 : memref<1x128xf32, #tpu.memory_space<any>>)
      %c1_i32_66 = arith.constant 1 : i32
      %94 = arith.addi %25, %c1_i32_66 : i32
      %c5_i32_67 = arith.constant 5 : i32
      %c0_i32_68 = arith.constant 0 : i32
      %95 = arith.cmpi eq, %c5_i32_67, %c0_i32_68 : i32
      %c1_i32_69 = arith.constant 1 : i32
      %96 = arith.select %95, %c1_i32_69, %c5_i32_67 : i32
      %97 = arith.remsi %94, %96 : i32
      %c0_i32_70 = arith.constant 0 : i32
      %98 = arith.cmpi ne, %97, %c0_i32_70 : i32
      %c0_i32_71 = arith.constant 0 : i32
      %99 = arith.cmpi slt, %97, %c0_i32_71 : i32
      %c0_i32_72 = arith.constant 0 : i32
      %100 = arith.cmpi slt, %96, %c0_i32_72 : i32
      %101 = arith.xori %99, %100 : i1
      %102 = arith.andi %101, %98 : i1
      %103 = arith.addi %97, %96 : i32
      %104 = arith.select %102, %103, %97 : i32
      %c0_i32_73 = arith.constant 0 : i32
      %c1_i32_74 = arith.constant 1 : i32
      %c1_i32_75 = arith.constant 1 : i32
      %c0_i32_76 = arith.constant 0 : i32
      %105 = tpu.memref_slice %arg7[%c0_i32_73, %c1_i32_75, %c0_i32_76] : memref<1x2x128xf32, #tpu.memory_space<vmem>> -> memref<1x1x128xf32, #tpu.memory_space<vmem>>
      %106 = tpu.memref_squeeze %105 : memref<1x1x128xf32, #tpu.memory_space<vmem>> -> memref<1x128xf32, #tpu.memory_space<vmem>>
      %c0_i32_77 = arith.constant 0 : i32
      %107 = tpu.memref_slice %arg8[%104, %c0_i32_77] : memref<5x128xf32, #tpu.memory_space<any>> -> memref<1x128xf32, #tpu.memory_space<any>>
      %108 = tpu.memref_slice %arg10[%c1_i32_74] : memref<2x!tpu.dma_semaphore, #tpu.memory_space<semaphore_mem>> -> memref<1x!tpu.dma_semaphore, #tpu.memory_space<semaphore_mem>>
      %109 = tpu.memref_squeeze %108 : memref<1x!tpu.dma_semaphore, #tpu.memory_space<semaphore_mem>> -> memref<!tpu.dma_semaphore, #tpu.memory_space<semaphore_mem>>
      tpu.wait_dma2 semaphore(%109 : memref<!tpu.dma_semaphore, #tpu.memory_space<semaphore_mem>>) src(%106 : memref<1x128xf32, #tpu.memory_space<vmem>>) dst(%107 : memref<1x128xf32, #tpu.memory_space<any>>)
    } else {
    }
    %c2_i32_22 = arith.constant 2 : i32
    %34 = arith.addi %13, %c2_i32_22 : i32
    %c5_i32_23 = arith.constant 5 : i32
    %c0_i32_24 = arith.constant 0 : i32
    %35 = arith.cmpi eq, %c5_i32_23, %c0_i32_24 : i32
    %c1_i32_25 = arith.constant 1 : i32
    %36 = arith.select %35, %c1_i32_25, %c5_i32_23 : i32
    %37 = arith.remsi %34, %36 : i32
    %c0_i32_26 = arith.constant 0 : i32
    %38 = arith.cmpi ne, %37, %c0_i32_26 : i32
    %c0_i32_27 = arith.constant 0 : i32
    %39 = arith.cmpi slt, %37, %c0_i32_27 : i32
    %c0_i32_28 = arith.constant 0 : i32
    %40 = arith.cmpi slt, %36, %c0_i32_28 : i32
    %41 = arith.xori %39, %40 : i1
    %42 = arith.andi %41, %38 : i1
    %43 = arith.addi %37, %36 : i32
    %44 = arith.select %42, %43, %37 : i32
    %c0_29 = arith.constant 0 : index
    %45 = memref.load %arg9[%c0_29] : memref<1xi32, #tpu.memory_space<smem>>
    memref.store %44, %arg9[%c0_29] : memref<1xi32, #tpu.memory_space<smem>>
    return
  }
  func.func @transform_0(%arg0: i32) -> (i32, i32) {
    %c0_i32 = arith.constant 0 : i32
    %c0_i32_0 = arith.constant 0 : i32
    return %arg0, %c0_i32 : i32, i32
  }
  func.func @transform_1(%arg0: i32) -> (i32, i32) {
    %c0_i32 = arith.constant 0 : i32
    %c0_i32_0 = arith.constant 0 : i32
    %c0_i32_1 = arith.constant 0 : i32
    return %c0_i32, %c0_i32_0 : i32, i32
  }
  func.func @transform_2(%arg0: i32) -> (i32, i32) {
    %c0_i32 = arith.constant 0 : i32
    %c0_i32_0 = arith.constant 0 : i32
    %c0_i32_1 = arith.constant 0 : i32
    return %c0_i32, %c0_i32_0 : i32, i32
  }
  func.func @transform_3(%arg0: i32) -> (i32, i32, i32) {
    %c0_i32 = arith.constant 0 : i32
    %c0_i32_0 = arith.constant 0 : i32
    %c0_i32_1 = arith.constant 0 : i32
    return %arg0, %c0_i32, %c0_i32_0 : i32, i32, i32
  }
  func.func @transform_4(%arg0: i32) -> i32 {
    %c0_i32 = arith.constant 0 : i32
    %c0_i32_0 = arith.constant 0 : i32
    return %c0_i32 : i32
  }
  func.func @transform_6(%arg0: i32) -> (i32, i32, i32) {
    %c0_i32 = arith.constant 0 : i32
    %c0_i32_0 = arith.constant 0 : i32
    %c0_i32_1 = arith.constant 0 : i32
    return %arg0, %c0_i32, %c0_i32_0 : i32, i32, i32
  }
  func.func @transform_8(%arg0: i32) -> i32 {
    %c0_i32 = arith.constant 0 : i32
    %c0_i32_0 = arith.constant 0 : i32
    return %c0_i32 : i32
  }
}

module attributes {stable_mosaic.version = 11 : i64} {
  func.func @_momentum_kernel(%arg0: i32, %arg1: memref<64x128xbf16, #tpu.memory_space<vmem>>, %arg2: memref<64x128xbf16, #tpu.memory_space<vmem>>, %arg3: memref<64x128xbf16, #tpu.memory_space<vmem>>) attributes {dimension_semantics = [#tpu.dimension_semantics<parallel>], iteration_bounds = array<i64: 3>, scalar_prefetch = 0 : i64, scratch_operands = 0 : i64, tpu.core_type = #tpu.core_type<tc>, window_params = [{transform_indices = @transform_0, window_bounds = array<i64: 64, 128>}, {transform_indices = @transform_1, window_bounds = array<i64: 64, 128>}, {transform_indices = @transform_2, window_bounds = array<i64: 64, 128>}]} {
    %c0 = arith.constant 0 : index
    %c0_0 = arith.constant 0 : index
    %0 = vector.load %arg1[%c0, %c0_0] : memref<64x128xbf16, #tpu.memory_space<vmem>>, vector<64x128xbf16>
    %1 = arith.extf %0 : vector<64x128xbf16> to vector<64x128xf32>
    %c0_1 = arith.constant 0 : index
    %c0_2 = arith.constant 0 : index
    %2 = vector.load %arg2[%c0_1, %c0_2] : memref<64x128xbf16, #tpu.memory_space<vmem>>, vector<64x128xbf16>
    %3 = arith.extf %2 : vector<64x128xbf16> to vector<64x128xf32>
    %cst = arith.constant 9.990000e-01 : f32
    %4 = vector.broadcast %cst : f32 to vector<64x128xf32>
    %5 = arith.mulf %3, %4 : vector<64x128xf32>
    %cst_3 = arith.constant 1.000000e-03 : f32
    %6 = vector.broadcast %cst_3 : f32 to vector<64x128xf32>
    %7 = arith.mulf %1, %6 : vector<64x128xf32>
    %8 = arith.addf %5, %7 : vector<64x128xf32>
    %9 = arith.truncf %8 : vector<64x128xf32> to vector<64x128xbf16>
    %c0_4 = arith.constant 0 : index
    %c0_5 = arith.constant 0 : index
    %10 = vector.load %arg3[%c0_4, %c0_5] : memref<64x128xbf16, #tpu.memory_space<vmem>>, vector<64x128xbf16>
    tpu.vector_store %arg3[%c0_4, %c0_5], %9 {strides = array<i32>} : memref<64x128xbf16, #tpu.memory_space<vmem>>, vector<64x128xbf16>,
    return
  }
  func.func @transform_0(%arg0: i32) -> (i32, i32) {
    %c0_i32 = arith.constant 0 : i32
    %c0_i32_0 = arith.constant 0 : i32
    return %arg0, %c0_i32 : i32, i32
  }
  func.func @transform_1(%arg0: i32) -> (i32, i32) {
    %c0_i32 = arith.constant 0 : i32
    %c0_i32_0 = arith.constant 0 : i32
    return %arg0, %c0_i32 : i32, i32
  }
  func.func @transform_2(%arg0: i32) -> (i32, i32) {
    %c0_i32 = arith.constant 0 : i32
    %c0_i32_0 = arith.constant 0 : i32
    return %arg0, %c0_i32 : i32, i32
  }
}

</mosaic_0001>

<bundles_post_ra>
// kernel: simcse_moco_forward.2
= control target key start
LH: loop header
LB: loop body
LE: loop exit
PB: predicated region body
PF: predicated region fallthrough
CT: control target
= control target key end

     0   :  { %s454_s9 = smov 0   ;;  %s479_s0 = inlined_call_operand.vmem [shape: bf16[192,128], index: 0, kind: input, shape index: {}]   ;;  %s480_s1 = inlined_call_operand.vmem [shape: bf16[192,128], index: 1, kind: input, shape index: {}, may-alias: {1,2}]   ;;  %s481_s2 = inlined_call_operand.vmem [shape: bf16[192,128], index: 2, kind: output, shape index: {}, may-alias: {1,2}]  }
   0x1 LB: > { %s333_s10 = sadd.s32 4294967295, %s437_s9   ;;  %p337_p0 = scmp.ge.s32.totalorder %s437_s9, 1  ;;  %s437_s9 = sphi %s454_s9, %s12_s9  }
   0x2   : > { %p124_p1 = scmp.lt.s32.totalorder %s437_s9, 4 }
   0x4   : > { %p125_p2 = pnand %p337_p0, %p124_p1 }
   0x5   : > { %s338_s11 = sshll.u32 (!%p125_p2), %s333_s10, 3 }
   0x6   : > { %128 = sbr.rel (%p125_p2) target bundleno = 32 (0x20), region = 28  ;;  %p152_p3 = scmp.lt.s32.totalorder (!%p125_p2), %s338_s11, 23 }
   0xd   : > { %s483_s11 = smov (!%p152_p3, %s338_s11), 23 }
   0xe   : > { %s462_s12 = sshll.u32 %s483_s11, 2 }
   0xf   : > { %s155_s15 = scalar_lea.vmem %s479_s0, %s462_s12  ;;  %s161_s18 = scalar_lea.vmem %s480_s1, %s462_s12 }
  0x10   : > { %v363_v0 = vld [vmem:[%s155_s15] sm:$0xff]   ;;  %v414_v1 = vld [vmem:[%s155_s15 + $0x8] sm:$0xff]   ;;  %v415_v2 = vld [vmem:[%s155_s15 + $0x10] sm:$0xff]   ;;  %s167_s21 = scalar_lea.vmem %s481_s2, %s462_s12 }
  0x11   : > { %v364_v3 = vunpack.c.l.bf16 %v363_v0  ;;  %v365_v4 = vunpack.c.h.bf16 %v363_v0  ;;  %v379_v5 = vld [vmem:[%s161_s18] sm:$0xff]   ;;  %v417_v6 = vld [vmem:[%s161_s18 + $0x8] sm:$0xff]   ;;  %v368_v7 = vunpack.c.l.bf16 %v414_v1  ;;  %v369_v8 = vunpack.c.h.bf16 %v414_v1  ;;  %v416_v11 = vld [vmem:[%s155_s15 + $0x18] sm:$0xff]  }
  0x12   : > { %v372_v9 = vunpack.c.l.bf16 %v415_v2  ;;  %v373_v10 = vunpack.c.h.bf16 %v415_v2  ;;  %v418_v12 = vld [vmem:[%s161_s18 + $0x10] sm:$0xff]   ;;  %v419_v13 = vld [vmem:[%s161_s18 + $0x18] sm:$0xff]   ;;  %v380_v14 = vunpack.c.l.bf16 %v379_v5  ;;  %v381_v15 = vunpack.c.h.bf16 %v379_v5 }
  0x13   : > { %v384_v16 = vunpack.c.l.bf16 %v417_v6  ;;  %v385_v17 = vunpack.c.h.bf16 %v417_v6  ;;  %v388_v18 = vunpack.c.l.bf16 %v418_v12  ;;  %v389_v19 = vunpack.c.h.bf16 %v418_v12 }
  0x14   : > { %v392_v20 = vunpack.c.l.bf16 %v419_v13  ;;  %v393_v21 = vunpack.c.h.bf16 %v419_v13  ;;  %v376_v22 = vunpack.c.l.bf16 %v416_v11  ;;  %v201_v23 = vmul.f32 0.999, %v380_v14 }
  0x15   : > { %v202_v24 = vmul.f32 0.999, %v381_v15  ;;  %v203_v25 = vmul.f32 0.999, %v384_v16  ;;  %v377_v26 = vunpack.c.h.bf16 %v416_v11  ;;  %v204_v27 = vmul.f32 0.999, %v385_v17 }
  0x16   : > { %v205_v28 = vmul.f32 0.999, %v388_v18  ;;  %v206_v29 = vmul.f32 0.999, %v389_v19  ;;  %v207_v30 = vmul.f32 0.999, %v392_v20 }
  0x17   : > { %v208_v31 = vmul.f32 0.999, %v393_v21  ;;  %v209_v32 = vmul.f32 0.001, %v364_v3  ;;  %v210_v33 = vmul.f32 0.001, %v365_v4 }
  0x18   : > { %v211_v34 = vmul.f32 0.001, %v368_v7  ;;  %v212_v35 = vmul.f32 0.001, %v369_v8  ;;  %v213_v36 = vmul.f32 0.001, %v372_v9 }
  0x19   : > { %v214_v37 = vmul.f32 0.001, %v373_v10  ;;  %v215_v38 = vmul.f32 0.001, %v376_v22  ;;  %v217_v39 = vadd.f32 %v209_v32, %v201_v23  ;;  %v216_v40 = vmul.f32 0.001, %v377_v26 }
  0x1a   : > { %v218_v41 = vadd.f32 %v210_v33, %v202_v24  ;;  %v219_v42 = vadd.f32 %v211_v34, %v203_v25  ;;  %v220_v43 = vadd.f32 %v212_v35, %v204_v27  ;;  %v221_v44 = vadd.f32 %v213_v36, %v205_v28 }
  0x1b   : > { %v222_v45 = vadd.f32 %v214_v37, %v206_v29  ;;  %v223_v46 = vadd.f32 %v215_v38, %v207_v30  ;;  %v224_v49 = vadd.f32 %v216_v40, %v208_v31 }
  0x1c   : > { %v397_v47 = vpack.c.bf16 %v218_v41, %v217_v39  ;;  %v402_v48 = vpack.c.bf16 %v220_v43, %v219_v42 }
  0x1d   : > { %v407_v50 = vpack.c.bf16 %v222_v45, %v221_v44  ;;  %v412_v51 = vpack.c.bf16 %v224_v49, %v223_v46 }
  0x1e   : > { %398 = vst [vmem:[%s167_s21] sm:$0xff] %v397_v47   ;;  %420 = vst [vmem:[%s167_s21 + $0x8] sm:$0xff] %v402_v48  }
  0x1f   : > { %421 = vst [vmem:[%s167_s21 + $0x10] sm:$0xff] %v407_v50   ;;  %422 = vst [vmem:[%s167_s21 + $0x18] sm:$0xff] %v412_v51  }
  0x20 PF: > { %s12_s9 = sadd.s32 1, %s437_s9  }
  0x21   : > { %p9_p4 = scmp.ge.s32.totalorder %s12_s9, 5  }
  0x23   :  { %11 = sbr.rel (!%p9_p4) target bundleno = 1 (0x1), region = 61 }

// kernel: simcse_moco_forward.3
= control target key start
LH: loop header
LB: loop body
LE: loop exit
PB: predicated region body
PF: predicated region fallthrough
CT: control target
= control target key end

     0   :  { %15 = vsyncpa [#allocation5], 0  ;;  %s780_s0 = inlined_call_operand.vmem [shape: bf16[16,128], index: 0, kind: input, shape index: {}]   ;;  %s781_s1 = inlined_call_operand.vmem [shape: bf16[128,128], index: 1, kind: input, shape index: {}]   ;;  %s782_s2 = inlined_call_operand.vmem [shape: f32[1,128], index: 2, kind: input, shape index: {}]   ;;  %s783_s3 = inlined_call_operand.vmem [shape: f32[1,2,16], index: 3, kind: input, shape index: {}]   ;;  %s784_s4 = inlined_call_operand.<no memory space> [shape: s32[1], index: 4, kind: input, shape index: {}]   ;;  %s785_s5 = inlined_call_operand.vmem [shape: f32[5,128], index: 5, kind: input, shape index: {}, may-alias: {5,7}]   ;;  %s786_s6 = inlined_call_operand.hbm [shape: f32[1,2,128], index: 6, kind: output, shape index: {0}]   ;;  %s787_s7 = inlined_call_operand.vmem [shape: f32[5,128], index: 7, kind: output, shape index: {1}, may-alias: {5,7}]   ;;  %s788_s8 = inlined_call_operand.hbm [shape: s32[1], index: 8, kind: output, shape index: {2}]  }
   0x1   :  { %16 = vsyncpa [#allocation6], 0  ;;  %v589_v0 = vld [vmem:[%s781_s1] sm:$0xff]   ;;  %v652_v1 = vmov 0.0   ;;  %v590_v2 = vld [vmem:[%s781_s1 + $0x8] sm:$0xff]   ;;  %vm653_vm0 = vmmov 0  }
   0x2   :  { %552 = vmatprep.subr.bf16.mxu0 %v652_v1  ;;  %568 = vmatprep.mubr.msk.bf16.mxu0 %vm653_vm0, %v652_v1  ;;  %v591_v3 = vld [vmem:[%s781_s1 + $0x10] sm:$0xff]   ;;  %v592_v4 = vld [vmem:[%s781_s1 + $0x18] sm:$0xff]   ;;  %v593_v5 = vld [vmem:[%s781_s1 + $0x20] sm:$0xff]   ;;  %v654_v10 = vmov 0.0|0.0   ;;  %vm151_vm1 = vcmask 130048   ;;  %s230_s25 = ssub.s32 0, %s784_s4 }
   0x3   :  { %553 = vmatpush3.bf16.msra.mxu0 %v589_v0  ;;  %576 = vmatprep.mubr.msk.f32.mxu1 %vm653_vm0, %v652_v1  ;;  %v594_v6 = vld [vmem:[%s781_s1 + $0x28] sm:$0xff]   ;;  %v595_v7 = vld [vmem:[%s781_s1 + $0x30] sm:$0xff]   ;;  %v596_v8 = vld [vmem:[%s781_s1 + $0x38] sm:$0xff]   ;;  %s524_s28 = smin.u32 %s230_s25, %s784_s4  ;;  %p229_p0 = scmp.lt.s32.totalorder %s784_s4, 0 }
   0x4   :  { %554 = vmatprep.subr.bf16.mxu0 %v652_v1  ;;  %v597_v9 = vld [vmem:[%s780_s0] sm:$0xff]   ;;  %579 = vmatprep.subr.bf16.mxu1 %v654_v10  ;;  %598 = sdivrem.u32 %s524_s28, 5 }
   0x5   :  { %v513_v11 = vld [vmem:[%s782_s2] ss:$0 sm:$0xff] }
   0x6   :  { %v150_v21 = vld [vmem:[%s783_s3] sm:$0x3] }
   0x7   :  { %555 = vmatpush3.bf16.msra.mxu0 %v590_v2 }
   0x8   :  { %556 = vmatprep.subr.bf16.mxu0 %v652_v1 }
   0xb   :  { %557 = vmatpush3.bf16.msra.mxu0 %v591_v3 }
   0xc   :  { %558 = vmatprep.subr.bf16.mxu0 %v652_v1 }
   0xd   :  { %s599_s30 = spop.drf %598 }
   0xe   :  { %s234_s9 = ssub.s32 0, %s599_s30 }
   0xf   :  { %559 = vmatpush3.bf16.msra.mxu0 %v592_v4  ;;  %s790_s9 = smov (!%p229_p0, %s234_s9), %s599_s30 }
  0x10   :  { %560 = vmatprep.subr.bf16.mxu0 %v652_v1  ;;  %p526_p1 = scmp.lt.s32.totalorder %s790_s9, 0  ;;  %s240_s3 = sadd.s32 5, %s790_s9 }
  0x12   :  { %s792_s3 = smov (!%p526_p1, %s240_s3), %s790_s9 }
  0x13   :  { %561 = vmatpush3.bf16.msra.mxu0 %v593_v5  ;;  %s242_s10 = sadd.s32 2, %s792_s3 }
  0x14   :  { %562 = vmatprep.subr.bf16.mxu0 %v652_v1  ;;  %p527_p2 = scmp.gt.s32.totalorder %s242_s10, 5 }
  0x15   :  { %s247_s13 = scalar_lea.vmem (!%p527_p2), %s787_s7, %s792_s3 }
  0x17   :  { %563 = vmatpush3.bf16.msra.mxu0 %v594_v6 }
  0x18   :  { %564 = vmatprep.subr.bf16.mxu0 %v652_v1 }
  0x1b   :  { %565 = vmatpush3.bf16.msra.mxu0 %v595_v7 }
  0x1c   :  { %566 = vmatprep.subr.bf16.mxu0 %v652_v1 }
  0x1f   :  { %567 = vmatpush3.bf16.msra.mxu0 %v596_v8 }
  0x22   :  { %569 = vmatmul.mubr.bf16.vlgmr.msra.gmra.mrb[0].mxu0 %v597_v9 }
  0xf5   :  { %v141_v12 = vpop.f32.mrb[0].mxu0 }
  0xf6   :  { %v142_v13 = vadd.f32 %v513_v11, %v141_v12  ;;  %v570_v14 = vpop.f32.mrb[1].mxu0 }
  0xf7   :  { %v144_v15 = vpop.f32.mrb[2].mxu0 }
  0xf8   :  { %v145_v16 = vadd.f32 %v513_v11, %v144_v15  ;;  %v571_v17 = vpop.f32.mrb[3].mxu0  ;;  %600 = vtanh.f32 %v142_v13 }
  0xfa   :  { %602 = vtanh.f32 %v145_v16 }
 0x102   :  { %v601_v18 = vpop.eup %600 }
 0x104   :  { %v603_v19 = vpop.eup %602 }
 0x105   :  { %v580_v20 = vpack.c.bf16 %v603_v19, %v601_v18 }
 0x107   :  { %581 = vmatpush3.bf16.msra.mxu1 %v580_v20 }
 0x10a   :  { %577 = vmatmul.mubr.msk.f32.vlgmr.msra.gmra.mrb[0].mxu1 %vm151_vm1, %v150_v21 }
 0x1d8   :  { %246 = sbr.rel (%p527_p2) target bundleno = 490 (0x1ea), region = 25 }
 0x1dd   :  { %v221_v22 = vpop.f32.mrb[0].mxu1 }
 0x1de   :  { %225 = vst [vmem:[#allocation4] sm:$0x3] %v221_v22  ;;  %v578_v23 = vpop.f32.mrb[1].mxu1 }
 0x1e5   :  { %v265_v24 = vld [vmem:[#allocation4] sm:$0x3] }
 0x1e6   :  { %266 = vst [vmem:[%s247_s13] sm:$0x3] %v265_v24 }
 0x1e7   :  { %291 = vsyncadd [#allocation2], 32 }
 0x1e8   :  { %642 = dma.done.wait [#allocation2], 32 }
 0x1e9   :  { %643 = vsyncadd [#allocation2], 4294967264 }
 0x1ea PF:  { %p528_p3 = scmp.le.s32.totalorder %s242_s10, 5 }
 0x1eb   :  { %s300_s14 = ssub.s32 (!%p528_p3), 0, %s792_s3  ;;  %p299_p4 = scmp.lt.s32.totalorder (!%p528_p3), %s792_s3, 0 }
 0x1ec   :  { %298 = sbr.rel (%p528_p3) target bundleno = 535 (0x217), region = 59  ;;  %s529_s15 = smin.u32 (!%p528_p3), %s300_s14, %s792_s3 }
 0x1ed   :  { %604 = sdivrem.u32 (!%p528_p3), %s529_s15, 5 }
 0x1f0   :  { %v330_v25 = vld [vmem:[#allocation4] sm:$0x1] (!%p528_p3) }
 0x1f6   :  { %s605_s16 = spop.drf %604 }
 0x1f7   :  { %s304_s17 = ssub.s32 0, %s605_s16 }
 0x1f8   :  { %s794_s17 = smov (!%p299_p4, %s304_s17), %s605_s16 }
 0x1f9   :  { %p531_p5 = scmp.lt.s32.totalorder %s794_s17, 0  ;;  %s310_s18 = sadd.s32 5, %s794_s17 }
 0x1fb   :  { %s796_s18 = smov (!%p531_p5, %s310_s18), %s794_s17 }
 0x1fc   :  { %s312_s21 = scalar_lea.vmem %s787_s7, %s796_s18 }
 0x1fd   :  { %331 = vst [vmem:[%s312_s21] sm:$0x1] %v330_v25 }
 0x1fe   :  { %356 = vsyncadd [#allocation2], 16  ;;  %s357_s22 = sadd.s32 1, %s792_s3  ;;  %v391_v26 = vld [vmem:[#allocation4 + $0x1] sm:$0x1] }
 0x1ff   :  { %s359_s23 = ssub.s32 0, %s357_s22  ;;  %p358_p6 = scmp.lt.s32.totalorder %s357_s22, 0 }
 0x200   :  { %s532_s0 = smin.u32 %s359_s23, %s357_s22 }
 0x201   :  { %606 = sdivrem.u32 %s532_s0, 5 }
 0x20a   :  { %s607_s1 = spop.drf %606 }
 0x20b   :  { %s363_s24 = ssub.s32 0, %s607_s1 }
 0x20c   :  { %s798_s24 = smov (!%p358_p6, %s363_s24), %s607_s1 }
 0x20d   :  { %p534_p7 = scmp.lt.s32.totalorder %s798_s24, 0  ;;  %s369_s2 = sadd.s32 5, %s798_s24 }
 0x20f   :  { %s800_s2 = smov (!%p534_p7, %s369_s2), %s798_s24 }
 0x210   :  { %s372_s27 = scalar_lea.vmem %s787_s7, %s800_s2 }
 0x211   :  { %392 = vst [vmem:[%s372_s27] sm:$0x1] %v391_v26 }
 0x212   :  { %417 = vsyncadd [#allocation2 + $0x1], 16 }
 0x213   :  { %644 = dma.done.wait [#allocation2], 16 }
 0x214   :  { %645 = vsyncadd [#allocation2], 4294967280 }
 0x215   :  { %646 = dma.done.wait [#allocation2 + $0x1], 16 }
 0x216   :  { %647 = vsyncadd [#allocation2 + $0x1], 4294967280 }
 0x217 PF:  { %s423_s5 = sadd.s32 2, %s784_s4  ;;  %s655_s30 = smov [#allocation4]  }
 0x218   :  { %s445_s9 = sshll.u32 %s655_s30, 4  ;;  %s425_s3 = ssub.s32 0, %s423_s5  ;;  %s446_s9 = int_to_ptr.vmem [resolvable:$true] %s445_s9 }
 0x219   :  { %s610_s10 = scalar_lea.vmem %s446_s9, 32  ;;  %p615_p9 = scmp.lt.s32.totalorder %s446_s9, %s446_s9 }
 0x21a   :  { %p611_p8 = scmp.ne.s32.totalorder %s446_s9, %s610_s10  ;;  %p616_p10 = scmp.lt.s32.totalorder %s610_s10, %s610_s10 }
 0x21c   :  { %p617_p11 = por %p616_p10, %p615_p9 }
 0x21e   :  { %p618_p12 = pnand %p617_p11, %p611_p8 }
 0x220   :  { %621 = shalt.err (!%p618_p12)
}
 0x221   :  { %s622_s12 = scalar_lea.hbm %s786_s6, 32 }
 0x222   :  { %p623_p13 = scmp.ne.s32.totalorder %s786_s6, %s622_s12  ;;  %p626_p0 = scmp.lt.u32.totalorder %s622_s12, %s786_s6 }
 0x224   :  { %p628_p1 = pnand %p626_p0, %p623_p13 }
 0x226   :  { %631 = shalt.err (!%p628_p1)
}
 0x227   :  { %448 = dma.vmem_to_hbm [thread:$0]  %s446_s9, 32, %s786_s6, [#allocation5]  }
 0x228   :  { %s535_s18 = smin.u32 %s425_s3, %s423_s5  ;;  %p424_p2 = scmp.lt.s32.totalorder %s423_s5, 0 }
 0x229   :  { %608 = sdivrem.u32 %s535_s18, 5  ;;  %s632_s0 = scalar_lea.hbm %s788_s8, 16 }
 0x22a   :  { %p633_p4 = scmp.ne.s32.totalorder %s788_s8, %s632_s0  ;;  %p636_p5 = scmp.lt.u32.totalorder %s632_s0, %s788_s8 }
 0x22c   :  { %p638_p6 = pnand %p636_p5, %p633_p4 }
 0x232   :  { %s609_s19 = spop.drf %608 }
 0x233   :  { %s429_s20 = ssub.s32 0, %s609_s19 }
 0x234   :  { %s802_s20 = smov (!%p424_p2, %s429_s20), %s609_s19 }
 0x235   :  { %p537_p3 = scmp.lt.s32.totalorder %s802_s20, 0  ;;  %s435_s21 = sadd.s32 5, %s802_s20 }
 0x237   :  { %s804_s21 = smov (!%p537_p3, %s435_s21), %s802_s20 }
 0x238   :  { %438 = sst [smem:[#allocation7]] %s804_s21 }
 0x239   :  { %641 = shalt.err (!%p638_p6)
}
 0x23a   :  { %s656_s25 = smov [#allocation7]  }
 0x23b   :  { %456 = dma.smem_to_hbm %s656_s25, 16, %s788_s8, [#allocation6]  }
 0x23c   :  { %648 = dma.done.wait [#allocation5], 32  }
 0x23d   :  { %649 = vsyncadd [#allocation5], 4294967264 }
 0x23e   :  { %650 = dma.done.wait [#allocation6], 16  }
 0x23f   :  { %651 = vsyncadd [#allocation6], 4294967280 }
 0x240   :  { %463 = sfence }
 0x241   :  { %464 = vsyncpa [#allocation5], 1 }
 0x242   :  { %465 = vsyncpa [#allocation6], 1 }
 0x243   :  { %466 = vsyncmov [#allocation2] }
 0x246   :  { %s467_s28 = vpop.sfrf %466 }
 0x247   :  { %p538_p7 = scmp.ne.s32.totalorder %s467_s28, 0 }
 0x249   :  { %471 = shalt.err (%p538_p7)  }
 0x24a   :  { %473 = vsyncmov [#allocation2 + $0x1] }
 0x24d   :  { %s474_s29 = vpop.sfrf %473 }
 0x24e   :  { %p539_p8 = scmp.ne.s32.totalorder %s474_s29, 0 }
 0x250   :  { %478 = shalt.err (%p539_p8)  }

</bundles_post_ra>
